<compile_context>
chip_gen: v7x
topology: tpu7x:2x2x1
jax: 0.10.0
libtpu: 0.0.40
codegen_flags: <defaults>
</compile_context>

<pallas_src>
import functools

import jax
import jax.numpy as jnp
from jax.experimental import pallas as pl
from jax.experimental.pallas import tpu as pltpu


def _round_up(a, b):
    return (a + b - 1) // b * b


def _choose_row_tile(n_pad8, c, target_bytes, max_rows):
    rows = max(8, min(max_rows, target_bytes // (c * 4)))
    rows = max(8, (rows // 8) * 8)
    return min(rows, n_pad8)


def _stats_kernel(batch_ref, x_ref, stats_ref, *, b_pad):
    """Accumulate per-graph [sum, sumsq, count] across row tiles."""
    t = pl.program_id(0)

    @pl.when(t == 0)
    def _():
        stats_ref[...] = jnp.zeros_like(stats_ref)

    xv = x_ref[...].astype(jnp.float32)                       # (TN, C)
    bt = batch_ref[...]                                       # (TN, 1) int32
    tn = xv.shape[0]

    gids = jax.lax.broadcasted_iota(jnp.int32, (tn, b_pad), 1)
    onehot = (bt == gids).astype(jnp.float32)                 # (TN, B_pad)

    row_sum = jnp.sum(xv, axis=1, keepdims=True)              # (TN, 1)
    row_sumsq = jnp.sum(xv * xv, axis=1, keepdims=True)       # (TN, 1)

    # Lane-dense (TN, 128) per-row stats: col0=sum, col1=sumsq, col2=1, rest 0.
    col = jax.lax.broadcasted_iota(jnp.int32, (tn, 128), 1)
    row_stats = jnp.where(
        col == 0, row_sum,
        jnp.where(col == 1, row_sumsq,
                  jnp.where(col == 2, 1.0, 0.0)))             # (TN, 128)

    # onehot^T @ row_stats on the MXU -> per-graph partial [sum, sumsq, count].
    acc = jax.lax.dot_general(
        onehot, row_stats, (((0,), (0,)), ((), ())),
        preferred_element_type=jnp.float32)                   # (B_pad, 128)
    stats_ref[...] += acc


def _norm_kernel(*refs, b_pad, c, apply_affine):
    """Finalize per-graph mean / inv_std and normalize one row tile."""
    if apply_affine:
        batch_ref, x_ref, stats_ref, w_ref, b_ref, out_ref = refs
    else:
        batch_ref, x_ref, stats_ref, out_ref = refs
        w_ref = b_ref = None

    xv = x_ref[...].astype(jnp.float32)                       # (TN, C)
    bt = batch_ref[...]                                       # (TN, 1) int32
    tn = xv.shape[0]

    stats = stats_ref[...]                                    # (B_pad, 128)
    g_sum = stats[:, 0:1]                                     # (B_pad, 1)
    g_sumsq = stats[:, 1:2]
    g_cnt = stats[:, 2:3]

    # count = clamp(degree, 1) * C  (exactly the module's denominator)
    inv_denom = 1.0 / (jnp.maximum(g_cnt, 1.0) * c)           # (B_pad, 1)
    mean_g = g_sum * inv_denom
    var_g = jnp.maximum(g_sumsq * inv_denom - mean_g * mean_g, 0.0)
    inv_std_g = jnp.where(var_g > 0.0, jax.lax.rsqrt(var_g), 0.0)  # (B_pad, 1)

    # Fused gather-back: one MXU dot returns [mean_n | inv_std_n] per node.
    colb = jax.lax.broadcasted_iota(jnp.int32, (b_pad, 128), 1)
    params = jnp.where(colb == 0, mean_g,
                       jnp.where(colb == 1, inv_std_g, 0.0))  # (B_pad, 128)

    gids = jax.lax.broadcasted_iota(jnp.int32, (tn, b_pad), 1)
    onehot = (bt == gids).astype(jnp.float32)                 # (TN, B_pad)
    node_params = jnp.dot(onehot, params,
                          preferred_element_type=jnp.float32)  # (TN, 128)
    mean_n = node_params[:, 0:1]
    inv_std_n = node_params[:, 1:2]

    out = (xv - mean_n) * inv_std_n
    if apply_affine:
        out = out * w_ref[...].astype(jnp.float32) + b_ref[...].astype(jnp.float32)
    out_ref[...] = out.astype(out_ref.dtype)


def graph_layer_norm(x, batch, num_graphs, weight=None, bias=None, *,
                     row_tile_bytes=2 << 20, max_rows=1024):
    """x: (N, C) float, batch: (N,) int, weight/bias: (1, C) or None (skip affine)."""
    N, C = x.shape
    apply_affine = (weight is not None) or (bias is not None)
    if apply_affine:
        w = (jnp.ones((1, C), x.dtype) if weight is None
             else weight.reshape(1, C).astype(x.dtype))
        b = (jnp.zeros((1, C), x.dtype) if bias is None
             else bias.reshape(1, C).astype(x.dtype))

    n_pad8 = _round_up(N, 8)
    tn = _choose_row_tile(n_pad8, C, row_tile_bytes, max_rows)
    n_pad = _round_up(N, tn)
    num_tiles = n_pad // tn
    b_pad = _round_up(max(int(num_graphs), 1), 128)

    batch_col = batch.astype(jnp.int32).reshape(N, 1)
    if n_pad != N:
        x_p = jnp.pad(x, ((0, n_pad - N), (0, 0)))
        batch_p = jnp.pad(batch_col, ((0, n_pad - N), (0, 0)), constant_values=-1)
    else:
        x_p, batch_p = x, batch_col

    vmem_limit = 32 * 1024 * 1024

    # Pass 1: per-graph [sum, sumsq, count] accumulator across row tiles.
    stats = pl.pallas_call(
        functools.partial(_stats_kernel, b_pad=b_pad),
        out_shape=jax.ShapeDtypeStruct((b_pad, 128), jnp.float32),
        grid=(num_tiles,),
        in_specs=[
            pl.BlockSpec((tn, 1), lambda t: (t, 0)),      # batch ids
            pl.BlockSpec((tn, C), lambda t: (t, 0)),      # x rows
        ],
        out_specs=pl.BlockSpec((b_pad, 128), lambda t: (0, 0)),
        compiler_params=pltpu.CompilerParams(
            dimension_semantics=("arbitrary",),
            vmem_limit_bytes=vmem_limit),
    )(batch_p, x_p)

    # Pass 2: normalize each row tile (parallel over tiles / TensorCores).
    in_specs = [
        pl.BlockSpec((tn, 1), lambda t: (t, 0)),          # batch ids
        pl.BlockSpec((tn, C), lambda t: (t, 0)),          # x rows
        pl.BlockSpec((b_pad, 128), lambda t: (0, 0)),     # per-graph stats
    ]
    args = [batch_p, x_p, stats]
    if apply_affine:
        in_specs += [pl.BlockSpec((1, C), lambda t: (0, 0)),
                     pl.BlockSpec((1, C), lambda t: (0, 0))]
        args += [w, b]

    out_p = pl.pallas_call(
        functools.partial(_norm_kernel, b_pad=b_pad, c=float(C),
                          apply_affine=apply_affine),
        out_shape=jax.ShapeDtypeStruct((n_pad, C), x.dtype),
        grid=(num_tiles,),
        in_specs=in_specs,
        out_specs=pl.BlockSpec((tn, C), lambda t: (t, 0)),
        compiler_params=pltpu.CompilerParams(
            dimension_semantics=("parallel",),
            vmem_limit_bytes=vmem_limit),
    )(*args)

    return out_p[:N] if n_pad != N else out_p


def _reference(x, batch, weight, bias, num_graphs):
    """Pure-JAX mirror of the PyTorch forward (two-pass formula)."""
    C = x.shape[1]
    deg = jnp.zeros((num_graphs,), x.dtype).at[batch].add(1.0)
    count = jnp.maximum(deg, 1.0)[:, None] * C                 # (B, 1)
    tmp = jnp.zeros((num_graphs, C), x.dtype).at[batch].add(x)
    mean = tmp.sum(axis=1, keepdims=True) / count              # (B, 1)
    diff = x - mean[batch]
    tmp2 = jnp.zeros((num_graphs, C), x.dtype).at[batch].add(diff * diff)
    var = tmp2.sum(axis=1, keepdims=True) / count              # (B, 1)
    out = diff / jnp.sqrt(var[batch])
    if weight is not None:
        out = out * weight
    if bias is not None:
        out = out + bias
    return out


if __name__ == "__main__":
    key = jax.random.PRNGKey(0)

    # Case 1: module-default shapes (in_channels=32), sorted PyG-style batch,
    # affine parameters applied exactly as in the forward (weight=1, bias=0).
    N, C, num_graphs = 16, 32, 3
    x = jax.random.normal(key, (N, C), dtype=jnp.float32)
    batch = jnp.array([0] * 6 + [1] * 5 + [2] * 5, dtype=jnp.int32)
    weight = jnp.ones((1, C), dtype=jnp.float32)
    bias = jnp.zeros((1, C), dtype=jnp.float32)

    out = graph_layer_norm(x, batch, num_graphs, weight, bias)
    out = jax.block_until_ready(out)
    ref = _reference(x, batch, weight, bias, num_graphs)
    assert out.shape == (N, C) and out.dtype == x.dtype
    assert jnp.allclose(out, ref, atol=1e-4, rtol=1e-4), "case 1 mismatch"

    # Case 2: unsorted batch, N not a multiple of the tile, multiple row tiles
    # (max_rows=8 forces 3 tiles + padded rows), affine skipped (weight=ones,
    # bias=zeros is a no-op -> fast path).
    N2, C2, num_graphs2 = 19, 32, 4
    key2 = jax.random.PRNGKey(0)
    x2 = jax.random.normal(key2, (N2, C2), dtype=jnp.float32)
    batch2 = jnp.array([0, 2, 1, 3, 0, 1, 2, 3, 0, 1,
                        2, 0, 3, 1, 0, 2, 1, 3, 0], dtype=jnp.int32)
    out2 = graph_layer_norm(x2, batch2, num_graphs2, max_rows=8)
    out2 = jax.block_until_ready(out2)
    ref2 = _reference(x2, batch2, None, None, num_graphs2)
    assert out2.shape == (N2, C2) and out2.dtype == x2.dtype
    assert jnp.allclose(out2, ref2, atol=1e-4, rtol=1e-4), "case 2 mismatch"

    print("KERNEL_OK")
</pallas_src>

<mosaic_0001>
module attributes {stable_mosaic.version = 11 : i64} {
  func.func @_stats_kernel(%arg0: i32, %arg1: memref<16x1xi32, #tpu.memory_space<vmem>>, %arg2: memref<16x32xf32, #tpu.memory_space<vmem>>, %arg3: memref<128x128xf32, #tpu.memory_space<vmem>>) attributes {dimension_semantics = [#tpu.dimension_semantics<arbitrary>], iteration_bounds = array<i64: 1>, scalar_prefetch = 0 : i64, scratch_operands = 0 : i64, tpu.core_type = #tpu.core_type<tc>, window_params = [{transform_indices = @transform_0, window_bounds = array<i64: 16, 1>}, {transform_indices = @transform_1, window_bounds = array<i64: 16, 32>}, {pipeline_mode = #tpu.pipeline_mode<synchronous>, transform_indices = @transform_2, window_bounds = array<i64: 128, 128>}]} {
    %c0_i32 = arith.constant 0 : i32
    %0 = arith.cmpi eq, %arg0, %c0_i32 : i32
    %1 = arith.extui %0 : i1 to i32
    %c0_i32_0 = arith.constant 0 : i32
    %2 = arith.cmpi ne, %1, %c0_i32_0 : i32
    scf.if %2 {
      %cst_13 = arith.constant 0.000000e+00 : f32
      %35 = vector.broadcast %cst_13 : f32 to vector<128x128xf32>
      %c0_14 = arith.constant 0 : index
      %c0_15 = arith.constant 0 : index
      %36 = vector.load %arg3[%c0_14, %c0_15] : memref<128x128xf32, #tpu.memory_space<vmem>>, vector<128x128xf32>
      tpu.vector_store %arg3[%c0_14, %c0_15], %35 {strides = array<i32>} : memref<128x128xf32, #tpu.memory_space<vmem>>, vector<128x128xf32>,
    } else {
    }
    %c0 = arith.constant 0 : index
    %c0_1 = arith.constant 0 : index
    %3 = vector.load %arg2[%c0, %c0_1] : memref<16x32xf32, #tpu.memory_space<vmem>>, vector<16x32xf32>
    %c0_2 = arith.constant 0 : index
    %c0_3 = arith.constant 0 : index
    %4 = vector.load %arg1[%c0_2, %c0_3] : memref<16x1xi32, #tpu.memory_space<vmem>>, vector<16x1xi32>
    %5 = tpu.iota {dimensions = array<i32: 1>} : vector<16x128xi32>
    %6 = vector.broadcast %4 : vector<16x1xi32> to vector<16x128xi32>
    %7 = arith.cmpi eq, %6, %5 : vector<16x128xi32>
    %8 = arith.extui %7 : vector<16x128xi1> to vector<16x128xi32>
    %9 = arith.sitofp %8 : vector<16x128xi32> to vector<16x128xf32>
    %cst = arith.constant dense<0.000000e+00> : vector<16xf32>
    %10 = vector.multi_reduction <add>, %3, %cst [1] : vector<16x32xf32> to vector<16xf32>
    %11 = vector.shape_cast %10 : vector<16xf32> to vector<16x1xf32>
    %12 = arith.mulf %3, %3 : vector<16x32xf32>
    %cst_4 = arith.constant dense<0.000000e+00> : vector<16xf32>
    %13 = vector.multi_reduction <add>, %12, %cst_4 [1] : vector<16x32xf32> to vector<16xf32>
    %14 = vector.shape_cast %13 : vector<16xf32> to vector<16x1xf32>
    %15 = tpu.iota {dimensions = array<i32: 1>} : vector<16x128xi32>
    %c0_i32_5 = arith.constant 0 : i32
    %16 = vector.broadcast %c0_i32_5 : i32 to vector<16x128xi32>
    %17 = arith.cmpi eq, %15, %16 : vector<16x128xi32>
    %c1_i32 = arith.constant 1 : i32
    %18 = vector.broadcast %c1_i32 : i32 to vector<16x128xi32>
    %19 = arith.cmpi eq, %15, %18 : vector<16x128xi32>
    %c2_i32 = arith.constant 2 : i32
    %20 = vector.broadcast %c2_i32 : i32 to vector<16x128xi32>
    %21 = arith.cmpi eq, %15, %20 : vector<16x128xi32>
    %cst_6 = arith.constant 1.000000e+00 : f32
    %cst_7 = arith.constant 0.000000e+00 : f32
    %22 = vector.broadcast %cst_6 : f32 to vector<16x128xf32>
    %23 = vector.broadcast %cst_7 : f32 to vector<16x128xf32>
    %24 = arith.select %21, %22, %23 : vector<16x128xi1>, vector<16x128xf32>
    %25 = vector.shape_cast %14 : vector<16x1xf32> to vector<16x1xf32>
    %26 = vector.broadcast %25 : vector<16x1xf32> to vector<16x128xf32>
    %27 = arith.select %19, %26, %24 : vector<16x128xi1>, vector<16x128xf32>
    %28 = vector.shape_cast %11 : vector<16x1xf32> to vector<16x1xf32>
    %29 = vector.broadcast %28 : vector<16x1xf32> to vector<16x128xf32>
    %30 = arith.select %17, %29, %27 : vector<16x128xi1>, vector<16x128xf32>
    %cst_8 = arith.constant dense<0.000000e+00> : vector<128x128xf32>
    %31 = tpu.matmul %9, %30, %cst_8 {dimension_numbers = #tpu.dot_dimension_numbers<[0], [0], [1], [1], [0, 1, 1, 1], [], []>} : vector<16x128xf32>, vector<16x128xf32>, vector<128x128xf32> -> vector<128x128xf32>
    %c0_9 = arith.constant 0 : index
    %c0_10 = arith.constant 0 : index
    %32 = vector.load %arg3[%c0_9, %c0_10] : memref<128x128xf32, #tpu.memory_space<vmem>>, vector<128x128xf32>
    %33 = arith.addf %32, %31 : vector<128x128xf32>
    %c0_11 = arith.constant 0 : index
    %c0_12 = arith.constant 0 : index
    %34 = vector.load %arg3[%c0_11, %c0_12] : memref<128x128xf32, #tpu.memory_space<vmem>>, vector<128x128xf32>
    tpu.vector_store %arg3[%c0_11, %c0_12], %33 {strides = array<i32>} : memref<128x128xf32, #tpu.memory_space<vmem>>, vector<128x128xf32>,
    return
  }
  func.func @transform_0(%arg0: i32) -> (i32, i32) {
    %c0_i32 = arith.constant 0 : i32
    %c0_i32_0 = arith.constant 0 : i32
    return %arg0, %c0_i32 : i32, i32
  }
  func.func @transform_1(%arg0: i32) -> (i32, i32) {
    %c0_i32 = arith.constant 0 : i32
    %c0_i32_0 = arith.constant 0 : i32
    return %arg0, %c0_i32 : i32, i32
  }
  func.func @transform_2(%arg0: i32) -> (i32, i32) {
    %c0_i32 = arith.constant 0 : i32
    %c0_i32_0 = arith.constant 0 : i32
    %c0_i32_1 = arith.constant 0 : i32
    return %c0_i32, %c0_i32_0 : i32, i32
  }
}

</mosaic_0001>

<bundles_post_ra>
// kernel: tpu_custom_call.1
= control target key start
LH: loop header
LB: loop body
LE: loop exit
PB: predicated region body
PF: predicated region fallthrough
CT: control target
= control target key end

     0   :  { %vm50_vm0 = vcmask 261120   ;;  %v463_v2 = vmov 0   ;;  %s527_s0 = inlined_call_operand.vmem [shape: s32[16,1], index: 0, kind: input, shape index: {}]   ;;  %s528_s1 = inlined_call_operand.vmem [shape: f32[16,32], index: 1, kind: input, shape index: {}]   ;;  %s529_s2 = inlined_call_operand.hbm [shape: f32[128,128], index: 2, kind: output, shape index: {}]  }
   0x1   :  { %v34_v0 = vld [vmem:[%s527_s0] sm:$0xff]  ;;  %438 = vset.pattern.permute.xlu0 %v463_v2  ;;  %v33_v4 = vld [vmem:[%s528_s1 + $0x8] sm:$0xff] }
   0x2   :  { %v32_v1 = vld [vmem:[%s528_s1] sm:$0xff] }
   0x3   :  { %v57_v3 = vmul.f32 %v32_v1, %v32_v1 }
   0x4   :  { %7 = vsyncpa [#allocation3], 0  ;;  %39 = vperm.xlu0 %438, %v34_v0   ;;  %v58_v5 = vmul.f32 %v33_v4, %v33_v4  ;;  %v35_v6 = vld [vmem:[%s527_s0 + $0x8] sm:$0xff]  ;;  %v54_v9 = vsel %vm50_vm0, %v33_v4, 0.0  ;;  %v51_v10 = vsel %vm50_vm0, %v32_v1, 0.0  ;;  %v36_v11 = vlaneseq  ;;  %s465_s0 = smov [#allocation2]  }
   0x5   :  { %v59_v7 = vsel %vm50_vm0, %v57_v3, 0.0  ;;  %v464_v14 = vmov 0.0   ;;  %vm105_vm6 = vcmask 130048   ;;  %s352_s1 = sshll.u32 %s465_s0, 4  ;;  %s353_s1 = int_to_ptr.vmem [resolvable:$true] %s352_s1 }
   0x6   :  { %60 = vadd.xlane.f32.xlu1 %v59_v7  ;;  %v62_v8 = vsel %vm50_vm0, %v58_v5, 0.0  ;;  %v37_v12 = vand.u32 127, %v36_v11  ;;  %s439_s17 = scalar_lea.vmem %s353_s1, 2048  ;;  %p444_p1 = scmp.lt.s32.totalorder %s353_s1, %s353_s1 }
   0x7   :  { %p440_p0 = scmp.ne.s32.totalorder %s353_s1, %s439_s17  ;;  %p445_p2 = scmp.lt.s32.totalorder %s439_s17, %s439_s17 }
   0x8   :  { %42 = vperm.xlu0 %438, %v35_v6   ;;  %vm67_vm3 = vcmp.eq.s32.totalorder %v37_v12, 2  ;;  %vm66_vm4 = vcmp.eq.s32.totalorder %v37_v12, 1  ;;  %vm65_vm5 = vcmp.eq.s32.totalorder %v37_v12, 0 }
   0x9   :  { %v68_v20 = vsel %vm67_vm3, 1.0, %v464_v14  ;;  %p446_p3 = por %p445_p2, %p444_p1 }
   0xa   :  { %63 = vadd.xlane.f32.xlu1 %v62_v8 }
   0xb   :  { %p447_p4 = pnand %p446_p3, %p440_p0 }
   0xe   :  { %55 = vadd.xlane.f32.xlu1 %v54_v9 }
  0x27   :  { %52 = vadd.xlane.f32.xlu0 %v51_v10 }
  0x83   :  { %v40_v13 = vpop.permute.xlu0 %39 }
  0x84   :  { %vm44_vm1 = vcmp.eq.s32.totalorder %v40_v13, %v37_v12 }
  0x85   :  { %v363_v15 = vsel %vm44_vm1, 1.0, %v464_v14 }
  0x86   :  { %73 = vxpose.xlu1.b32.start [1/2] (short) %v363_v15, 128 }
  0x87   :  { %v43_v16 = vpop.permute.xlu0 %42 }
  0x88   :  { %vm45_vm2 = vcmp.eq.s32.totalorder %v43_v16, %v37_v12 }
  0x89   :  { %v364_v17 = vsel %vm45_vm2, 1.0, %v464_v14 }
  0x8a   :  { %74 = vxpose.xlu1.b32.end [2/2] (short) %v364_v17, 128 }
  0x93   :  { %v61_v18 = vpop.xlane.xlu1 %60 }
  0x94   :  { %v69_v23 = vsel %vm66_vm4, %v61_v18, %v68_v20 }
  0x97   :  { %v64_v19 = vpop.xlane.xlu1 %63 }
  0x98   :  { %v70_v21 = vsel %vm66_vm4, %v64_v19, %v68_v20 }
  0x9b   :  { %v56_v22 = vpop.xlane.xlu1 %55 }
  0x9c   :  { %v72_v24 = vsel %vm65_vm5, %v56_v22, %v70_v21 }
  0xb4   :  { %v53_v25 = vpop.xlane.xlu0 %52 }
  0xb5   :  { %v71_v26 = vsel %vm65_vm5, %v53_v25, %v69_v23 }
  0xb6   :  { %v427_v27 = vpack.c.bf16 %v72_v24, %v71_v26 }
  0xb8   :  { %428 = vmatprep.subr.bf16.mxu0 %v427_v27  ;;  %431 = vmatprep.subr.bf16.mxu1 %v427_v27 }
  0xb9   :  { %430 = vmatpush3.bf16.msra.mxu0 %v427_v27  ;;  %432 = vmatpush3.bf16.msra.mxu1 %v427_v27 }
 0x106   :  { %v89_v28 = vpop.trf.xlu1 }
 0x107   :  { %403 = vmatprep.mubr.msk.f32.mxu0 %vm105_vm6, %v89_v28 }
 0x10a   :  { %v90_v29 = vpop.trf.xlu1 }
 0x10b   :  { %404 = vmatmul.mubr.msk.f32.vlgmr.msra.gmra.mrb[0].mxu0 %vm105_vm6, %v90_v29 }
 0x10e   :  { %v91_v30 = vpop.trf.xlu1 }
 0x10f   :  { %406 = vmatprep.mubr.msk.f32.mxu0 %vm105_vm6, %v91_v30 }
 0x112   :  { %v92_v31 = vpop.trf.xlu1 }
 0x113   :  { %407 = vmatmul.mubr.msk.f32.gmra.mrb[2].mxu0 %vm105_vm6, %v92_v31 }
 0x116   :  { %v93_v32 = vpop.trf.xlu1 }
 0x117   :  { %409 = vmatprep.mubr.msk.f32.mxu0 %vm105_vm6, %v93_v32 }
 0x11a   :  { %v94_v33 = vpop.trf.xlu1 }
 0x11b   :  { %410 = vmatmul.mubr.msk.f32.gmra.mrb[4].mxu0 %vm105_vm6, %v94_v33 }
 0x11e   :  { %v95_v34 = vpop.trf.xlu1 }
 0x11f   :  { %412 = vmatprep.mubr.msk.f32.mxu0 %vm105_vm6, %v95_v34 }
 0x122   :  { %v96_v35 = vpop.trf.xlu1 }
 0x123   :  { %413 = vmatmul.mubr.msk.f32.gmra.mrb[6].mxu0 %vm105_vm6, %v96_v35 }
 0x126   :  { %v97_v36 = vpop.trf.xlu1 }
 0x127   :  { %415 = vmatprep.mubr.msk.f32.mxu1 %vm105_vm6, %v97_v36 }
 0x12a   :  { %v98_v37 = vpop.trf.xlu1 }
 0x12b   :  { %416 = vmatmul.mubr.msk.f32.vlgmr.msra.gmra.mrb[0].mxu1 %vm105_vm6, %v98_v37 }
 0x12e   :  { %v99_v38 = vpop.trf.xlu1 }
 0x12f   :  { %418 = vmatprep.mubr.msk.f32.mxu1 %vm105_vm6, %v99_v38 }
 0x132   :  { %v100_v39 = vpop.trf.xlu1 }
 0x133   :  { %419 = vmatmul.mubr.msk.f32.gmra.mrb[2].mxu1 %vm105_vm6, %v100_v39 }
 0x136   :  { %v101_v40 = vpop.trf.xlu1 }
 0x137   :  { %421 = vmatprep.mubr.msk.f32.mxu1 %vm105_vm6, %v101_v40 }
 0x13a   :  { %v102_v41 = vpop.trf.xlu1 }
 0x13b   :  { %422 = vmatmul.mubr.msk.f32.gmra.mrb[4].mxu1 %vm105_vm6, %v102_v41 }
 0x13e   :  { %v103_v42 = vpop.trf.xlu1 }
 0x13f   :  { %424 = vmatprep.mubr.msk.f32.mxu1 %vm105_vm6, %v103_v42 }
 0x142   :  { %v104_v43 = vpop.trf.xlu1 }
 0x143   :  { %425 = vmatmul.mubr.msk.f32.gmra.mrb[6].mxu1 %vm105_vm6, %v104_v43 }
 0x1de   :  { %v405_v44 = vpop.f32.mrb[0].mxu0 }
 0x1df   :  { %v220_v45 = vpop.f32.mrb[1].mxu0  ;;  %332 = vst [vmem:[#allocation2 + $0x8] sm:$0xff] %v405_v44 }
 0x1e0   :  { %331 = vst [vmem:[#allocation2] sm:$0xff] %v220_v45 }
 0x1e6   :  { %v408_v46 = vpop.f32.mrb[2].mxu0 }
 0x1e7   :  { %v230_v47 = vpop.f32.mrb[3].mxu0  ;;  %334 = vst [vmem:[#allocation2 + $0x18] sm:$0xff] %v408_v46 }
 0x1e8   :  { %333 = vst [vmem:[#allocation2 + $0x10] sm:$0xff] %v230_v47 }
 0x1ee   :  { %v411_v48 = vpop.f32.mrb[4].mxu0 }
 0x1ef   :  { %v240_v49 = vpop.f32.mrb[5].mxu0  ;;  %336 = vst [vmem:[#allocation2 + $0x28] sm:$0xff] %v411_v48 }
 0x1f0   :  { %335 = vst [vmem:[#allocation2 + $0x20] sm:$0xff] %v240_v49 }
 0x1f6   :  { %v414_v50 = vpop.f32.mrb[6].mxu0 }
 0x1f7   :  { %v250_v51 = vpop.f32.mrb[7].mxu0  ;;  %338 = vst [vmem:[#allocation2 + $0x38] sm:$0xff] %v414_v50 }
 0x1f8   :  { %337 = vst [vmem:[#allocation2 + $0x30] sm:$0xff] %v250_v51 }
 0x1fe   :  { %v417_v52 = vpop.f32.mrb[0].mxu1 }
 0x1ff   :  { %v260_v53 = vpop.f32.mrb[1].mxu1  ;;  %340 = vst [vmem:[#allocation2 + $0x48] sm:$0xff] %v417_v52 }
 0x200   :  { %339 = vst [vmem:[#allocation2 + $0x40] sm:$0xff] %v260_v53 }
 0x206   :  { %v420_v54 = vpop.f32.mrb[2].mxu1 }
 0x207   :  { %v270_v55 = vpop.f32.mrb[3].mxu1  ;;  %342 = vst [vmem:[#allocation2 + $0x58] sm:$0xff] %v420_v54 }
 0x208   :  { %341 = vst [vmem:[#allocation2 + $0x50] sm:$0xff] %v270_v55 }
 0x20e   :  { %v423_v56 = vpop.f32.mrb[4].mxu1 }
 0x20f   :  { %v280_v57 = vpop.f32.mrb[5].mxu1  ;;  %344 = vst [vmem:[#allocation2 + $0x68] sm:$0xff] %v423_v56 }
 0x210   :  { %343 = vst [vmem:[#allocation2 + $0x60] sm:$0xff] %v280_v57 }
 0x216   :  { %v426_v58 = vpop.f32.mrb[6].mxu1 }
 0x217   :  { %v290_v59 = vpop.f32.mrb[7].mxu1  ;;  %346 = vst [vmem:[#allocation2 + $0x78] sm:$0xff] %v426_v58 }
 0x218   :  { %345 = vst [vmem:[#allocation2 + $0x70] sm:$0xff] %v290_v59 }
 0x219   :  { %450 = shalt.err (!%p447_p4)
}
 0x21a   :  { %s451_s20 = scalar_lea.hbm %s529_s2, 2048 }
 0x21b   :  { %p452_p5 = scmp.ne.s32.totalorder %s529_s2, %s451_s20  ;;  %p455_p6 = scmp.lt.u32.totalorder %s451_s20, %s529_s2 }
 0x21d   :  { %p457_p7 = pnand %p455_p6, %p452_p5 }
 0x21f   :  { %460 = shalt.err (!%p457_p7)
}
 0x220   :  { %s466_s25 = smov 128   ;;  %s467_s26 = smov 8  }
 0x221   :  { %358 = dma.vmem_to_hbm [thread:$0]  %s353_s1, 2048, %s529_s2, [#allocation3], %s466_s25, %s466_s25, %s467_s26  }
 0x222   :  { %461 = dma.done.wait [#allocation3], 2048  }
 0x223   :  { %462 = vsyncadd [#allocation3], 4294965248 }
 0x224   :  { %362 = vsyncpa [#allocation3], 1 }

</bundles_post_ra>
